<compile_context>
chip_gen: v7x
topology: tpu7x:2x2x1
jax: 0.10.0
libtpu: 0.0.40
codegen_flags: <defaults>
</compile_context>

<pallas_src>
import functools

import jax
import jax.numpy as jnp
from jax.experimental import pallas as pl
from jax.experimental.pallas import tpu as pltpu


def _coord_deconv_kernel(x_ref, w_ref, c_ref, o_ref, *, NB, H, Hq, GW, phase_plan):
    """One grid step = NB batch elements.

    x_ref : (NB, H, W*Cin)    bf16  activations (NHWC, (W, Cin) merged into the lane axis)
    w_ref : (W*Cin, L)        bf16  shifted-block-diagonal deconv weight (data channels),
                                    L = n_groups * GW, one 256-lane group per (phase, kh)
    c_ref : (H, L)            f32   precomputed coord-channel contribution (same lane layout)
    o_ref : (NB, S2, Hq, GW)  f32   phase-decomposed, lane-dense output
    """
    WCin = x_ref.shape[-1]

    # ---- single fused MXU matmul: all batch rows, taps and output columns at once -------------
    x2 = x_ref[...].reshape(NB * H, WCin)
    z = jnp.dot(x2, w_ref[...], preferred_element_type=jnp.float32)        # (NB*H, L)

    row = jax.lax.broadcasted_iota(jnp.int32, (H, GW), 0)

    for b in range(NB):                                                    # static unroll
        zb = z[b * H:(b + 1) * H, :] + c_ref[...]                          # (H, L), coord add (VPU)
        for phase, grp in enumerate(phase_plan):
            G = len(grp)
            if G == 0:                        # phase hit by no tap (only possible if s > K)
                o_ref[b, phase, :, :] = jnp.zeros((Hq, GW), jnp.float32)
                continue
            # 256-lane-aligned slices of the matmul result; column shift already in the weight.
            parts = [zb[:, g * GW:(g + 1) * GW] for g in grp]              # each (H, GW)
            # Combine kh row-offset groups in registers: XLU sublane roll + mask, no RMW.
            acc = parts[0]
            for qh in range(1, G):
                shifted = pltpu.roll(parts[qh], shift=qh, axis=0)
                acc = acc + jnp.where(row >= qh, shifted, 0.0)
            o_ref[b, phase, 0:H, :] = acc                                  # one full-width store
            # Bottom border rows H-1+t (t = 1..G-1): contributions from groups with qh >= t.
            for t in range(1, G):
                bot = parts[t][H - 1:H, :]
                for qh in range(t + 1, G):
                    bot = bot + parts[qh][H - 1 + t - qh:H + t - qh, :]
                o_ref[b, phase, H - 1 + t:H + t, :] = bot
            # Remaining rows are never covered by a tap and are cropped by the wrapper; keep them
            # deterministic with a single small zero store.
            if Hq > H + G - 1:
                o_ref[b, phase, H + G - 1:Hq, :] = jnp.zeros((Hq - H - G + 1, GW), jnp.float32)


def fuse_coords_nchw(x):
    # Reference-only helper; matches _fuse_coords: xs = 1 - 2*i/h (rows), ys = 2*j/w (cols).
    n, _, h, w = x.shape
    ii = jnp.arange(h, dtype=x.dtype)
    jj = jnp.arange(w, dtype=x.dtype)
    xs = jnp.broadcast_to((1.0 - 2.0 * ii / h)[:, None], (h, w))
    ys = jnp.broadcast_to((2.0 * jj / w)[None, :], (h, w))
    coords = jnp.stack([xs, ys], axis=0)[None]
    return jnp.concatenate([x, jnp.broadcast_to(coords, (n, 2, h, w))], axis=1)


def coord_deconv(x_nchw, weight, stride, *, batch_block=1):
    """x_nchw: (N, Cin, H, W); weight: PyTorch ConvTranspose2d layout (Cin+2, Cout, K, K).

    batch_block: batch elements per grid step.  Default 1 (keeps a >=2-wide parallel grid for the
    two v7x TensorCores when N >= 2).  On single-TC v5e/v6e pass batch_block=N to fold the batch
    into one grid step / one fused matmul.
    """
    N, Cin, H, W = (int(d) for d in x_nchw.shape)
    K = int(weight.shape[-1])
    Cout = int(weight.shape[1])
    s = int(stride)
    assert int(weight.shape[0]) == Cin + 2, "ConvTranspose2d weight must have Cin+2 input channels"
    NB = int(batch_block)
    assert N % NB == 0, "batch_block must divide N"

    Ho, Wo = (H - 1) * s + K, (W - 1) * s + K
    q = (K - 1) // s
    Hq, Wq = H + q, W + q
    S2 = s * s

    GW = pl.cdiv(Wq * Cout, 128) * 128          # lane-dense, 128-aligned per-group width
    assert GW % Cout == 0, "Cout must divide the padded lane-group width"
    Wq_pad = GW // Cout

    # ---- phase / group plan: one group per (phase, kh), column (kw) shifts live in the weight --
    group_defs = []                              # (kh, kw_list)
    phase_plan = []                              # per phase: tuple of group indices, qh-ordered
    g = 0
    for rh in range(s):
        for rw in range(s):
            kh_list = list(range(rh, K, s))
            kw_list = list(range(rw, K, s))
            idxs = []
            if kw_list:
                for kh in kh_list:
                    group_defs.append((kh, tuple(kw_list)))
                    idxs.append(g)
                    g += 1
            phase_plan.append(tuple(idxs))
    n_groups = g
    L = n_groups * GW

    # ---- shifted block-diagonal weight:  (W*(Cin+2)) rows  x  (n_groups*GW) lane-dense cols -----
    # wfull[iw, ci, gi, iw + kw//s, co] = weight[ci, co, kh, kw]   for each kw in the group's list.
    Cs = Cin + 2
    w_f32 = weight.astype(jnp.float32)
    wfull = jnp.zeros((W, Cs, n_groups, Wq_pad, Cout), jnp.float32)
    iw = jnp.arange(W)
    for gi, (kh, kw_list) in enumerate(group_defs):
        for kw in kw_list:
            qw = kw // s
            blk = jnp.broadcast_to(w_f32[:, :, kh, kw][None], (W, Cs, Cout))
            wfull = wfull.at[iw, :, gi, iw + qw, :].add(blk)
    wfull = wfull.reshape(W, Cs, L)
    w_data = wfull[:, :Cin, :].reshape(W * Cin, L).astype(jnp.bfloat16)   # MXU operand
    w_coord = wfull[:, Cin:, :].reshape(W * 2, L)                         # kept exact f32

    # ---- coord contribution, precomputed exactly in f32 (same lane layout as the matmul) -------
    hs = jnp.arange(H, dtype=jnp.float32)
    ws = jnp.arange(W, dtype=jnp.float32)
    xs = 1.0 - 2.0 * hs / H                      # varies over H (matches _fuse_coords' xs)
    ys = 2.0 * ws / W                            # varies over W (matches _fuse_coords' ys)
    xc = jnp.stack([jnp.broadcast_to(xs[:, None], (H, W)),
                    jnp.broadcast_to(ys[None, :], (H, W))], axis=-1).reshape(H, W * 2)
    coord_add = jnp.dot(xc, w_coord, precision=jax.lax.Precision.HIGHEST)  # (H, L) f32

    # ---- activations: NCHW -> (N, H, W*Cin) bf16 (f32 accumulation stays in-kernel) ------------
    x_rows = jnp.transpose(x_nchw, (0, 2, 3, 1)).reshape(N, H, W * Cin).astype(jnp.bfloat16)

    kern = functools.partial(_coord_deconv_kernel, NB=NB, H=H, Hq=Hq, GW=GW,
                             phase_plan=tuple(phase_plan))

    out_phases = pl.pallas_call(
        kern,
        out_shape=jax.ShapeDtypeStruct((N, S2, Hq, GW), jnp.float32),
        grid=(N // NB,),
        in_specs=[
            pl.BlockSpec((NB, H, W * Cin), lambda i: (i, 0, 0)),
            pl.BlockSpec((W * Cin, L), lambda i: (0, 0)),
            pl.BlockSpec((H, L), lambda i: (0, 0)),
        ],
        out_specs=pl.BlockSpec((NB, S2, Hq, GW), lambda i: (i, 0, 0, 0)),
        compiler_params=pltpu.CompilerParams(dimension_semantics=("parallel",)),
    )(x_rows, w_data, coord_add)

    # Phase interleave / crop / NCHW transpose: pure layout glue (negligible at these shapes).
    out = out_phases.reshape(N, s, s, Hq, Wq_pad, Cout)
    out = jnp.transpose(out, (0, 3, 1, 4, 2, 5)).reshape(N, Hq * s, Wq_pad * s, Cout)
    out = out[:, :Ho, :Wo, :]
    return jnp.transpose(out, (0, 3, 1, 2))                               # NCHW (PyTorch convention)


if __name__ == "__main__":
    key = jax.random.PRNGKey(0)
    kx, kw = jax.random.split(key)

    N, Cin, H, W = 2, 4, 16, 16
    Cout, K, stride = 8, 3, 2

    x = jax.random.normal(kx, (N, Cin, H, W), dtype=jnp.float32)
    # nn.ConvTranspose2d(inp + 2, out, kernel_size=3, bias=False).weight shape:
    weight = 0.1 * jax.random.normal(kw, (Cin + 2, Cout, K, K), dtype=jnp.float32)

    y = jax.block_until_ready(coord_deconv(x, weight, stride))

    # Reference: transposed conv == lhs-dilated conv with flipped/transposed kernel, built from
    # the same bf16-rounded data-channel operands the kernel consumes (coord path stays f32).
    xq = x.astype(jnp.bfloat16).astype(jnp.float32)
    wq = jnp.concatenate(
        [weight[:Cin].astype(jnp.bfloat16).astype(jnp.float32), weight[Cin:]], axis=0)
    x_aug = fuse_coords_nchw(xq)
    w_oihw = jnp.transpose(wq, (1, 0, 2, 3))[:, :, ::-1, ::-1]
    y_ref = jax.lax.conv_general_dilated(
        x_aug, w_oihw, window_strides=(1, 1),
        padding=[(K - 1, K - 1), (K - 1, K - 1)],
        lhs_dilation=(stride, stride),
        dimension_numbers=("NCHW", "OIHW", "NCHW"),
        precision=jax.lax.Precision.HIGHEST)

    assert y.shape == (N, Cout, (H - 1) * stride + K, (W - 1) * stride + K), y.shape
    err = float(jnp.max(jnp.abs(y - y_ref)))
    assert err < 1e-3, err
    print("KERNEL_OK")
</pallas_src>

<mosaic_0001>
module attributes {stable_mosaic.version = 11 : i64} {
  func.func @_coord_deconv_kernel(%arg0: i32, %arg1: memref<1x16x64xbf16, #tpu.memory_space<vmem>>, %arg2: memref<64x1536xbf16, #tpu.memory_space<vmem>>, %arg3: memref<16x1536xf32, #tpu.memory_space<vmem>>, %arg4: memref<1x4x17x256xf32, #tpu.memory_space<vmem>>) attributes {dimension_semantics = [#tpu.dimension_semantics<parallel>], iteration_bounds = array<i64: 2>, scalar_prefetch = 0 : i64, scratch_operands = 0 : i64, tpu.core_type = #tpu.core_type<tc>, window_params = [{transform_indices = @transform_0, window_bounds = array<i64: 1, 16, 64>}, {pipeline_mode = #tpu.pipeline_mode<synchronous>, transform_indices = @transform_1, window_bounds = array<i64: 64, 1536>}, {pipeline_mode = #tpu.pipeline_mode<synchronous>, transform_indices = @transform_2, window_bounds = array<i64: 16, 1536>}, {transform_indices = @transform_3, window_bounds = array<i64: 1, 4, 17, 256>}]} {
    %c0 = arith.constant 0 : index
    %c0_0 = arith.constant 0 : index
    %c0_1 = arith.constant 0 : index
    %0 = vector.load %arg1[%c0, %c0_0, %c0_1] : memref<1x16x64xbf16, #tpu.memory_space<vmem>>, vector<1x16x64xbf16>
    %1 = vector.shape_cast %0 : vector<1x16x64xbf16> to vector<16x64xbf16>
    %c0_2 = arith.constant 0 : index
    %c0_3 = arith.constant 0 : index
    %2 = vector.load %arg2[%c0_2, %c0_3] : memref<64x1536xbf16, #tpu.memory_space<vmem>>, vector<64x1536xbf16>
    %cst = arith.constant dense<0.000000e+00> : vector<16x1536xf32>
    %3 = tpu.matmul %1, %2, %cst {dimension_numbers = #tpu.dot_dimension_numbers<[1], [0], [0], [1], [0, 0, 1, 1], [], []>} : vector<16x64xbf16>, vector<64x1536xbf16>, vector<16x1536xf32> -> vector<16x1536xf32>
    %4 = tpu.iota {dimensions = array<i32: 0>} : vector<16x256xi32>
    %c0_4 = arith.constant 0 : index
    %c0_5 = arith.constant 0 : index
    %5 = vector.load %arg3[%c0_4, %c0_5] : memref<16x1536xf32, #tpu.memory_space<vmem>>, vector<16x1536xf32>
    %6 = arith.addf %3, %5 : vector<16x1536xf32>
    %7 = vector.extract_strided_slice %6 {offsets = [0, 0], sizes = [16, 256], strides = [1, 1]} : vector<16x1536xf32> to vector<16x256xf32>
    %8 = vector.extract_strided_slice %6 {offsets = [0, 256], sizes = [16, 256], strides = [1, 1]} : vector<16x1536xf32> to vector<16x256xf32>
    %c1_i32 = arith.constant 1 : i32
    %9 = tpu.dynamic_rotate %8 by %c1_i32 dim 0 : vector<16x256xf32>, i32 -> vector<16x256xf32>
    %c1_i32_6 = arith.constant 1 : i32
    %10 = vector.broadcast %c1_i32_6 : i32 to vector<16x256xi32>
    %11 = arith.cmpi sge, %4, %10 : vector<16x256xi32>
    %cst_7 = arith.constant 0.000000e+00 : f32
    %12 = vector.broadcast %cst_7 : f32 to vector<16x256xf32>
    %13 = arith.select %11, %9, %12 : vector<16x256xi1>, vector<16x256xf32>
    %14 = arith.addf %7, %13 : vector<16x256xf32>
    %c0_8 = arith.constant 0 : index
    %c0_9 = arith.constant 0 : index
    %c0_10 = arith.constant 0 : index
    %c0_11 = arith.constant 0 : index
    %15 = vector.load %arg4[%c0_8, %c0_9, %c0_10, %c0_11] : memref<1x4x17x256xf32, #tpu.memory_space<vmem>>, vector<1x1x16x256xf32>
    %16 = vector.shape_cast %15 : vector<1x1x16x256xf32> to vector<16x256xf32>
    %17 = vector.shape_cast %14 : vector<16x256xf32> to vector<1x1x16x256xf32>
    tpu.vector_store %arg4[%c0_8, %c0_9, %c0_10, %c0_11], %17 {strides = array<i32>} : memref<1x4x17x256xf32, #tpu.memory_space<vmem>>, vector<1x1x16x256xf32>,
    %18 = vector.extract_strided_slice %8 {offsets = [15, 0], sizes = [1, 256], strides = [1, 1]} : vector<16x256xf32> to vector<1x256xf32>
    %c0_12 = arith.constant 0 : index
    %c0_13 = arith.constant 0 : index
    %c16 = arith.constant 16 : index
    %c0_14 = arith.constant 0 : index
    %19 = vector.load %arg4[%c0_12, %c0_13, %c16, %c0_14] : memref<1x4x17x256xf32, #tpu.memory_space<vmem>>, vector<1x1x1x256xf32>
    %20 = vector.shape_cast %19 : vector<1x1x1x256xf32> to vector<1x256xf32>
    %21 = vector.shape_cast %18 : vector<1x256xf32> to vector<1x1x1x256xf32>
    tpu.vector_store %arg4[%c0_12, %c0_13, %c16, %c0_14], %21 {strides = array<i32>} : memref<1x4x17x256xf32, #tpu.memory_space<vmem>>, vector<1x1x1x256xf32>,
    %22 = vector.extract_strided_slice %6 {offsets = [0, 512], sizes = [16, 256], strides = [1, 1]} : vector<16x1536xf32> to vector<16x256xf32>
    %23 = vector.extract_strided_slice %6 {offsets = [0, 768], sizes = [16, 256], strides = [1, 1]} : vector<16x1536xf32> to vector<16x256xf32>
    %c1_i32_15 = arith.constant 1 : i32
    %24 = tpu.dynamic_rotate %23 by %c1_i32_15 dim 0 : vector<16x256xf32>, i32 -> vector<16x256xf32>
    %c1_i32_16 = arith.constant 1 : i32
    %25 = vector.broadcast %c1_i32_16 : i32 to vector<16x256xi32>
    %26 = arith.cmpi sge, %4, %25 : vector<16x256xi32>
    %cst_17 = arith.constant 0.000000e+00 : f32
    %27 = vector.broadcast %cst_17 : f32 to vector<16x256xf32>
    %28 = arith.select %26, %24, %27 : vector<16x256xi1>, vector<16x256xf32>
    %29 = arith.addf %22, %28 : vector<16x256xf32>
    %c0_18 = arith.constant 0 : index
    %c1 = arith.constant 1 : index
    %c0_19 = arith.constant 0 : index
    %c0_20 = arith.constant 0 : index
    %30 = vector.load %arg4[%c0_18, %c1, %c0_19, %c0_20] : memref<1x4x17x256xf32, #tpu.memory_space<vmem>>, vector<1x1x16x256xf32>
    %31 = vector.shape_cast %30 : vector<1x1x16x256xf32> to vector<16x256xf32>
    %32 = vector.shape_cast %29 : vector<16x256xf32> to vector<1x1x16x256xf32>
    tpu.vector_store %arg4[%c0_18, %c1, %c0_19, %c0_20], %32 {strides = array<i32>} : memref<1x4x17x256xf32, #tpu.memory_space<vmem>>, vector<1x1x16x256xf32>,
    %33 = vector.extract_strided_slice %23 {offsets = [15, 0], sizes = [1, 256], strides = [1, 1]} : vector<16x256xf32> to vector<1x256xf32>
    %c0_21 = arith.constant 0 : index
    %c1_22 = arith.constant 1 : index
    %c16_23 = arith.constant 16 : index
    %c0_24 = arith.constant 0 : index
    %34 = vector.load %arg4[%c0_21, %c1_22, %c16_23, %c0_24] : memref<1x4x17x256xf32, #tpu.memory_space<vmem>>, vector<1x1x1x256xf32>
    %35 = vector.shape_cast %34 : vector<1x1x1x256xf32> to vector<1x256xf32>
    %36 = vector.shape_cast %33 : vector<1x256xf32> to vector<1x1x1x256xf32>
    tpu.vector_store %arg4[%c0_21, %c1_22, %c16_23, %c0_24], %36 {strides = array<i32>} : memref<1x4x17x256xf32, #tpu.memory_space<vmem>>, vector<1x1x1x256xf32>,
    %37 = vector.extract_strided_slice %6 {offsets = [0, 1024], sizes = [16, 256], strides = [1, 1]} : vector<16x1536xf32> to vector<16x256xf32>
    %c0_25 = arith.constant 0 : index
    %c2 = arith.constant 2 : index
    %c0_26 = arith.constant 0 : index
    %c0_27 = arith.constant 0 : index
    %38 = vector.load %arg4[%c0_25, %c2, %c0_26, %c0_27] : memref<1x4x17x256xf32, #tpu.memory_space<vmem>>, vector<1x1x16x256xf32>
    %39 = vector.shape_cast %38 : vector<1x1x16x256xf32> to vector<16x256xf32>
    %40 = vector.shape_cast %37 : vector<16x256xf32> to vector<1x1x16x256xf32>
    tpu.vector_store %arg4[%c0_25, %c2, %c0_26, %c0_27], %40 {strides = array<i32>} : memref<1x4x17x256xf32, #tpu.memory_space<vmem>>, vector<1x1x16x256xf32>,
    %cst_28 = arith.constant 0.000000e+00 : f32
    %41 = vector.broadcast %cst_28 : f32 to vector<1x256xf32>
    %c0_29 = arith.constant 0 : index
    %c2_30 = arith.constant 2 : index
    %c16_31 = arith.constant 16 : index
    %c0_32 = arith.constant 0 : index
    %42 = vector.load %arg4[%c0_29, %c2_30, %c16_31, %c0_32] : memref<1x4x17x256xf32, #tpu.memory_space<vmem>>, vector<1x1x1x256xf32>
    %43 = vector.shape_cast %42 : vector<1x1x1x256xf32> to vector<1x256xf32>
    %44 = vector.shape_cast %41 : vector<1x256xf32> to vector<1x1x1x256xf32>
    tpu.vector_store %arg4[%c0_29, %c2_30, %c16_31, %c0_32], %44 {strides = array<i32>} : memref<1x4x17x256xf32, #tpu.memory_space<vmem>>, vector<1x1x1x256xf32>,
    %45 = vector.extract_strided_slice %6 {offsets = [0, 1280], sizes = [16, 256], strides = [1, 1]} : vector<16x1536xf32> to vector<16x256xf32>
    %c0_33 = arith.constant 0 : index
    %c3 = arith.constant 3 : index
    %c0_34 = arith.constant 0 : index
    %c0_35 = arith.constant 0 : index
    %46 = vector.load %arg4[%c0_33, %c3, %c0_34, %c0_35] : memref<1x4x17x256xf32, #tpu.memory_space<vmem>>, vector<1x1x16x256xf32>
    %47 = vector.shape_cast %46 : vector<1x1x16x256xf32> to vector<16x256xf32>
    %48 = vector.shape_cast %45 : vector<16x256xf32> to vector<1x1x16x256xf32>
    tpu.vector_store %arg4[%c0_33, %c3, %c0_34, %c0_35], %48 {strides = array<i32>} : memref<1x4x17x256xf32, #tpu.memory_space<vmem>>, vector<1x1x16x256xf32>,
    %cst_36 = arith.constant 0.000000e+00 : f32
    %49 = vector.broadcast %cst_36 : f32 to vector<1x256xf32>
    %c0_37 = arith.constant 0 : index
    %c3_38 = arith.constant 3 : index
    %c16_39 = arith.constant 16 : index
    %c0_40 = arith.constant 0 : index
    %50 = vector.load %arg4[%c0_37, %c3_38, %c16_39, %c0_40] : memref<1x4x17x256xf32, #tpu.memory_space<vmem>>, vector<1x1x1x256xf32>
    %51 = vector.shape_cast %50 : vector<1x1x1x256xf32> to vector<1x256xf32>
    %52 = vector.shape_cast %49 : vector<1x256xf32> to vector<1x1x1x256xf32>
    tpu.vector_store %arg4[%c0_37, %c3_38, %c16_39, %c0_40], %52 {strides = array<i32>} : memref<1x4x17x256xf32, #tpu.memory_space<vmem>>, vector<1x1x1x256xf32>,
    return
  }
  func.func @transform_0(%arg0: i32) -> (i32, i32, i32) {
    %c0_i32 = arith.constant 0 : i32
    %c0_i32_0 = arith.constant 0 : i32
    %c0_i32_1 = arith.constant 0 : i32
    return %arg0, %c0_i32, %c0_i32_0 : i32, i32, i32
  }
  func.func @transform_1(%arg0: i32) -> (i32, i32) {
    %c0_i32 = arith.constant 0 : i32
    %c0_i32_0 = arith.constant 0 : i32
    %c0_i32_1 = arith.constant 0 : i32
    return %c0_i32, %c0_i32_0 : i32, i32
  }
  func.func @transform_2(%arg0: i32) -> (i32, i32) {
    %c0_i32 = arith.constant 0 : i32
    %c0_i32_0 = arith.constant 0 : i32
    %c0_i32_1 = arith.constant 0 : i32
    return %c0_i32, %c0_i32_0 : i32, i32
  }
  func.func @transform_3(%arg0: i32) -> (i32, i32, i32, i32) {
    %c0_i32 = arith.constant 0 : i32
    %c0_i32_0 = arith.constant 0 : i32
    %c0_i32_1 = arith.constant 0 : i32
    %c0_i32_2 = arith.constant 0 : i32
    return %arg0, %c0_i32, %c0_i32_0, %c0_i32_1 : i32, i32, i32, i32
  }
}

</mosaic_0001>

<bundles_post_ra>
// kernel: tpu_custom_call.1
= control target key start
LH: loop header
LB: loop body
LE: loop exit
PB: predicated region body
PF: predicated region fallthrough
CT: control target
= control target key end

     0   :  { %8 = vsyncpa [#allocation3], 0  ;;  %s1661_s0 = inlined_call_operand.hbm [shape: bf16[2,16,64], index: 0, kind: input, shape index: {}]   ;;  %s1662_s1 = inlined_call_operand.hbm [shape: bf16[64,1536], index: 1, kind: input, shape index: {}]   ;;  %s1663_s2 = inlined_call_operand.hbm [shape: f32[16,1536], index: 2, kind: input, shape index: {}]   ;;  %s1664_s3 = inlined_call_operand.vmem [shape: f32[2,4,17,256], index: 3, kind: output, shape index: {}]  }
   0x1   :  { %10 = vsyncpa [#allocation3 + $0x1], 0 }
   0x2   :  { %11 = vsyncpa [#allocation5], 0  ;;  %s1392_s12 = smov 0   ;;  %s1394_s13 = smov 0  }
   0x3   :  { %s1396_s14 = smov 0   ;;  %s1398_s15 = smov 0  }
   0x4 LB: > { %s1411_s16 = sadd.s32 4294967295, %s1358_s15   ;;  %p37_p0 = scmp.ne.s32.totalorder %s1350_s13, %s1346_s12  ;;  %s1358_s15 = sphi %s1398_s15, %s1681_s15   ;;  %s1354_s14 = sphi %s1396_s14, %s1680_s14   ;;  %s1350_s13 = sphi %s1394_s13, %s1679_s13   ;;  %s1346_s12 = sphi %s1392_s12, %s1678_s12  }
   0x5   : > { %p1665_p1 = scmp.eq.s32.totalorder %s1411_s16, 0  ;;  %p1005_p2 = scmp.ge.s32.totalorder %s1358_s15, 1 }
   0x6   : > { %p116_p3 = scmp.lt.s32.totalorder %s1358_s15, 3  ;;  %s1360_s19 = smov [#allocation4]  }
   0x7   : > { %p1419_p4 = por %p1665_p1, %p37_p0  ;;  %s128_s20 = sshll.u32 %s1360_s19, 4  ;;  %s129_s20 = int_to_ptr.vmem [resolvable:$true] %s128_s20 }
   0x8   : > { %p1423_p5 = pnand %p1005_p2, %p116_p3  ;;  %s1361_s22 = smov [#allocation6]  }
   0x9   : > { %s1668_s17 = scalar_select %p1419_p4, 1, 0 }
   0xa   : > { %s1669_s18 = scalar_select %p1423_p5, 1, 0 }
   0xb   : > { %p1102_p6 = pneg %p1423_p5  ;;  %s141_s23 = sshll.u32 %s1361_s22, 4  ;;  %s1435_s23 = int_to_ptr.vmem [resolvable:$true] %s141_s23 }
   0xc   : > { %s1234_s26 = scalar_lea.hbm %s1662_s1, 6144 }
   0xd   : > { %p1431_p7 = pnand %p1102_p6, %p1665_p1  ;;  %p1235_p8 = scmp.ne.s32.totalorder %s1662_s1, %s1234_s26 }
   0xe   : > { %p1241_p12 = scmp.lt.u32.totalorder %s1234_s26, %s1662_s1 }
   0xf   : > { %p1236_p9 = pneg %p1431_p7 }
  0x11   : > { %p1237_p10 = pnand %p1236_p9, %p1235_p8 }
  0x13   : > { %p1238_p11 = pneg %p1237_p10 }
  0x15   : > { %p1243_p13 = pnand %p1241_p12, %p1238_p11 }
  0x17   : > { %1246 = shalt.err (!%p1243_p13)
}
  0x18   : > { %s1247_s4 = scalar_lea.vmem %s129_s20, 6144  ;;  %p1255_p6 = scmp.lt.s32.totalorder %s129_s20, %s129_s20 }
  0x19   : > { %p1248_p0 = scmp.ne.s32.totalorder %s129_s20, %s1247_s4  ;;  %p1256_p1 = scmp.lt.s32.totalorder %s1247_s4, %s1247_s4 }
  0x1b   : > { %p1250_p2 = pnand %p1248_p0, %p1236_p9  ;;  %p1257_p4 = por %p1256_p1, %p1255_p6 }
  0x1d   : > { %p1251_p3 = pneg %p1250_p2 }
  0x1f   : > { %p1258_p5 = pnand %p1257_p4, %p1251_p3 }
  0x21   : > { %1261 = shalt.err (!%p1258_p5)
}
  0x22   : > { %s1362_s5 = smov 768   ;;  %s1363_s6 = smov 48  }
  0x23   : > { %1105 = dma.hbm_to_vmem [thread:$0]  (!%p1431_p7), %s1662_s1, 6144, %s129_s20, [#allocation5], %s1362_s5, %s1362_s5, %s1363_s6  }
  0x24   : > { %s1262_s11 = scalar_lea.hbm %s1663_s2, 3072 }
  0x25   : > { %p1263_p8 = scmp.ne.s32.totalorder %s1663_s2, %s1262_s11  ;;  %p1269_p5 = scmp.lt.u32.totalorder %s1262_s11, %s1663_s2 }
  0x27   : > { %p1265_p1 = pnand %p1263_p8, %p1236_p9 }
  0x29   : > { %p1266_p4 = pneg %p1265_p1 }
  0x2b   : > { %p1271_p10 = pnand %p1269_p5, %p1266_p4 }
  0x2d   : > { %1274 = shalt.err (!%p1271_p10)
}
  0x2e   : > { %s1275_s20 = scalar_lea.vmem %s1435_s23, 3072  ;;  %p1283_p0 = scmp.lt.s32.totalorder %s1435_s23, %s1435_s23 }
  0x2f   : > { %p1276_p11 = scmp.ne.s32.totalorder %s1435_s23, %s1275_s20  ;;  %p1284_p2 = scmp.lt.s32.totalorder %s1275_s20, %s1275_s20 }
  0x31   : > { %p1278_p12 = pnand %p1276_p11, %p1236_p9  ;;  %p1285_p3 = por %p1284_p2, %p1283_p0 }
  0x33   : > { %p1279_p13 = pneg %p1278_p12 }
  0x35   : > { %p1286_p6 = pnand %p1285_p3, %p1279_p13 }
  0x37   : > { %1289 = shalt.err (!%p1286_p6)
}
  0x38   : > { %s1364_s25 = smov 1536   ;;  %s1365_s26 = smov 96  }
  0x39   : > { %1108 = dma.hbm_to_vmem [thread:$0]  (!%p1431_p7), %s1663_s2, 3072, %s1435_s23, [#allocation5], %s1364_s25, %s1364_s25, %s1365_s26  }
  0x3a   : > { %s1485_s29 = sadd.s32 1, %s1358_s15   ;;  %s24_s4 = sadd.s32 1, %s1354_s14 }
  0x3b   : > { %s21_s30 = ssub.s32 %s1358_s15, %s1485_s29  ;;  %p31_p8 = scmp.ne.s32.totalorder %s1354_s14, %s1350_s13 }
  0x3c   : > { %p22_p9 = scmp.eq.s32.totalorder %s21_s30, 0  ;;  %p32_p1 = scmp.eq.s32.totalorder %s1358_s15, 0 }
  0x3d   : > { %p1115_p5 = scmp.lt.s32.totalorder %s1358_s15, 2  ;;  %s155_s6 = sand.u32 1, %s1354_s14  }
  0x3e   : > { %s1494_s5 = scalar_select %p22_p9, %s1354_s14, %s24_s4  }
  0x3f   : > { %p33_p4 = por %p32_p1, %p31_p8  ;;  %s1090_s7 = sshll.u32 %s1358_s15, 7 }
  0x40   : > { %s1009_s8 = sshll.u32 %s155_s6, 3  ;;  %s1502_s10 = scalar_lea.hbm %s1661_s0, %s1090_s7 }
  0x41   : > { %s159_s23 = scalar_lea.vmem [#allocation2], %s1009_s8  ;;  %p1504_p7 = pnand %p1115_p5, %p33_p4 }
  0x42   : > { %s166_s11 = sshll.u32 %s159_s23, 4  ;;  %s1510_s15 = scalar_lea.sflag [#allocation3], %s155_s6  ;;  %s1508_s11 = int_to_ptr.vmem [resolvable:$true] %s166_s11 }
  0x43   : > { %s1290_s19 = scalar_lea.hbm %s1502_s10, 128  ;;  %p1292_p11 = pneg %p1504_p7 }
  0x44   : > { %p1291_p10 = scmp.ne.s32.totalorder %s1502_s10, %s1290_s19  ;;  %s1295_s20 = scalar_lea.hbm %s1661_s0, 256 }
  0x45   : > { %p1296_p0 = scmp.lt.u32.totalorder %s1502_s10, %s1661_s0  ;;  %p1297_p2 = scmp.lt.u32.totalorder %s1295_s20, %s1290_s19 }
  0x46   : > { %p1293_p12 = pnand %p1292_p11, %p1291_p10  ;;  %p1299_p6 = scmp.lt.u32.totalorder %s1290_s19, %s1502_s10 }
  0x47   : > { %p1298_p3 = por %p1297_p2, %p1296_p0 }
  0x48   : > { %p1294_p13 = pneg %p1293_p12 }
  0x49   : > { %p1300_p9 = por %p1299_p6, %p1298_p3 }
  0x4b   : > { %p1301_p8 = pnand %p1300_p9, %p1294_p13 }
  0x4d   : > { %1304 = shalt.err (!%p1301_p8)
}
  0x4e   : > { %s1305_s27 = scalar_lea.vmem %s1508_s11, 128  ;;  %s1366_s28 = smov [#allocation2]  }
  0x4f   : > { %p1306_p1 = scmp.ne.s32.totalorder %s1508_s11, %s1305_s27  ;;  %s1310_s30 = sshll.u32 %s1366_s28, 4  ;;  %s1311_s30 = int_to_ptr.vmem [resolvable:$false] %s1310_s30 }
  0x50   : > { %s1312_s4 = scalar_lea.vmem %s1311_s30, 256  ;;  %p1313_p10 = scmp.lt.s32.totalorder %s1508_s11, %s1311_s30 }
  0x51   : > { %p1308_p4 = pnand %p1306_p1, %p1292_p11  ;;  %p1314_p12 = scmp.lt.s32.totalorder %s1312_s4, %s1305_s27 }
  0x53   : > { %p1309_p5 = pneg %p1308_p4  ;;  %p1315_p0 = por %p1314_p12, %p1313_p10 }
  0x55   : > { %p1316_p2 = pnand %p1315_p0, %p1309_p5 }
  0x57   : > { %1319 = shalt.err (!%p1316_p2)
}
  0x58   : > { %s1367_s6 = smov 64   ;;  %s1368_s7 = smov 4  }
  0x59   : > { %1112 = dma.hbm_to_vmem [thread:$0]  (!%p1504_p7), %s1502_s10, 128, %s1508_s11, %s1510_s15, %s1367_s6, %s1367_s6, %s1368_s7  }
  0x5a   : > { %p1672_p11 = scmp.ne.s32.totalorder %s1669_s18, 0 }
  0x5b   : > { %s180_s8 = sand.u32 (!%p1672_p11), 1, %s1350_s13   ;;  %p1673_p13 = scmp.ne.s32.totalorder (!%p1672_p11), %s1668_s17, 0 }
  0x5c   : > { %178 = sbr.rel (%p1672_p11) target bundleno = 371 (0x173), region = 32  ;;  %s1541_s21 = sshll.u32 (!%p1672_p11), %s180_s8, 3 }
  0x5d   : > { %s181_s9 = scalar_lea.sflag (!%p1672_p11), [#allocation3], %s180_s8  ;;  %s184_s23 = scalar_lea.vmem (!%p1672_p11), [#allocation2], %s1541_s21 }
  0x63   : > { %1337 = dma.done.wait (%p1673_p13), %s181_s9, 128  }
  0x64   : > { %1339 = vsyncadd (%p1673_p13), %s181_s9, 4294967168  ;;  %p1674_p3 = scmp.eq.s32.totalorder %s1411_s16, 0 }
  0x66   : > { %1341 = dma.done.wait (%p1674_p3), [#allocation5], 9216   ;;  %p1675_p7 = pmov %p1674_p3 }
  0x67   : > { %v1369_v0 = vmov 0   ;;  %v1161_v1 = vld [vmem:[#allocation4 + $0x4] ss:$48 sps:$4 sm:$0xff]   ;;  %v1163_v2 = vld [vmem:[#allocation4 + $0xc] ss:$48 sps:$4 sm:$0xff]   ;;  %vm543_vm0 = vcmask 523264   ;;  %v271_v50 = vlaneseq }
  0x68   : > { %1343 = vsyncadd (%p1675_p7), [#allocation5], 4294958080  ;;  %579 = vmatprep.mubr.bf16.mxu0 %v1369_v0  ;;  %622 = vmatprep.mubr.bf16.mxu1 %v1369_v0  ;;  %v1165_v3 = vld [vmem:[#allocation4] ss:$48 sps:$4 sm:$0xff]   ;;  %v1166_v4 = vld [vmem:[#allocation4 + $0x8] ss:$48 sps:$4 sm:$0xff]  }
  0x69   : > { %547 = vmatprep.subr.bf16.mxu0 %v1161_v1  ;;  %590 = vmatprep.subr.bf16.mxu1 %v1163_v2  ;;  %v1167_v5 = vld [vmem:[#allocation4 + $0x64] ss:$48 sps:$4 sm:$0xff]   ;;  %v1169_v6 = vld [vmem:[#allocation4 + $0x6c] ss:$48 sps:$4 sm:$0xff]   ;;  %v1171_v7 = vld [vmem:[#allocation4 + $0x60] ss:$48 sps:$4 sm:$0xff]  }
  0x6a   : > { %548 = vmatpush1.bf16.msra.mxu0 %v1165_v3  ;;  %591 = vmatpush1.bf16.msra.mxu1 %v1166_v4  ;;  %v1172_v8 = vld [vmem:[#allocation4 + $0x68] ss:$48 sps:$4 sm:$0xff]   ;;  %v1173_v9 = vld [vmem:[#allocation4 + $0xc4] ss:$48 sps:$4 sm:$0xff]   ;;  %v1175_v10 = vld [vmem:[#allocation4 + $0xcc] ss:$48 sps:$4 sm:$0xff]  }
  0x6b   : > { %549 = vmatprep.subr.bf16.mxu0 %v1167_v5  ;;  %592 = vmatprep.subr.bf16.mxu1 %v1169_v6  ;;  %v1177_v11 = vld [vmem:[#allocation4 + $0xc0] ss:$48 sps:$4 sm:$0xff]   ;;  %v1178_v12 = vld [vmem:[#allocation4 + $0xc8] ss:$48 sps:$4 sm:$0xff]   ;;  %v1179_v13 = vld [vmem:[#allocation4 + $0x124] ss:$48 sps:$4 sm:$0xff]  }
  0x6c   : > { %v1181_v14 = vld [vmem:[#allocation4 + $0x12c] ss:$48 sps:$4 sm:$0xff]   ;;  %v1183_v15 = vld [vmem:[#allocation4 + $0x120] ss:$48 sps:$4 sm:$0xff]   ;;  %v1184_v16 = vld [vmem:[#allocation4 + $0x128] ss:$48 sps:$4 sm:$0xff]  }
  0x6d   : > { %v1188_v17 = vld [vmem:[#allocation4 + $0x14] ss:$48 sps:$4 sm:$0xff]   ;;  %v1191_v18 = vld [vmem:[#allocation4 + $0x1c] ss:$48 sps:$4 sm:$0xff]   ;;  %v1186_v20 = vld [vmem:[#allocation4 + $0x10] ss:$48 sps:$4 sm:$0xff]  }
  0x6e   : > { %550 = vmatpush1.bf16.msra.mxu0 %v1171_v7  ;;  %593 = vmatpush1.bf16.msra.mxu1 %v1172_v8  ;;  %v1556_v19 = vld [vmem:[%s184_s23] sm:$0xff]   ;;  %p215_p6 = scmp.lt.s32.totalorder %s1411_s16, 1  ;;  %vm1581_vm1 = vcmp.lt.s32.totalorder %v271_v50, 256  ;;  %v1370_v52 = vmov 0.0   ;;  %v1371_v53 = vmov 1966171168  }
  0x6f   : > { %551 = vmatprep.subr.bf16.mxu0 %v1173_v9  ;;  %594 = vmatprep.subr.bf16.mxu1 %v1175_v10  ;;  %v1189_v21 = vld [vmem:[#allocation4 + $0x18] ss:$48 sps:$4 sm:$0xff]   ;;  %v1194_v22 = vld [vmem:[#allocation4 + $0x74] ss:$48 sps:$4 sm:$0xff]   ;;  %v1197_v23 = vld [vmem:[#allocation4 + $0x7c] ss:$48 sps:$4 sm:$0xff]   ;;  %v832_v54 = vunpack.c.l.s4 %v1371_v53 }
  0x70   : > { %v1192_v24 = vld [vmem:[#allocation4 + $0x70] ss:$48 sps:$4 sm:$0xff]   ;;  %v1195_v25 = vld [vmem:[#allocation4 + $0x78] ss:$48 sps:$4 sm:$0xff]   ;;  %v1200_v26 = vld [vmem:[#allocation4 + $0xd4] ss:$48 sps:$4 sm:$0xff]  }
  0x71   : > { %v1203_v27 = vld [vmem:[#allocation4 + $0xdc] ss:$48 sps:$4 sm:$0xff]   ;;  %v1198_v28 = vld [vmem:[#allocation4 + $0xd0] ss:$48 sps:$4 sm:$0xff]   ;;  %v1201_v29 = vld [vmem:[#allocation4 + $0xd8] ss:$48 sps:$4 sm:$0xff]   ;;  %v833_v1 = vunpack.c.0.s8 %v832_v54 }
  0x72   : > { %552 = vmatpush1.bf16.msra.mxu0 %v1177_v11  ;;  %595 = vmatpush1.bf16.msra.mxu1 %v1178_v12  ;;  %v1206_v30 = vld [vmem:[#allocation4 + $0x134] ss:$48 sps:$4 sm:$0xff]   ;;  %v1209_v31 = vld [vmem:[#allocation4 + $0x13c] ss:$48 sps:$4 sm:$0xff]   ;;  %v1204_v32 = vld [vmem:[#allocation4 + $0x130] ss:$48 sps:$4 sm:$0xff]  }
  0x73   : > { %553 = vmatprep.subr.bf16.mxu0 %v1179_v13  ;;  %596 = vmatprep.subr.bf16.mxu1 %v1181_v14  ;;  %v1207_v33 = vld [vmem:[#allocation4 + $0x138] ss:$48 sps:$4 sm:$0xff]   ;;  %v1212_v34 = vld [vmem:[#allocation4 + $0x24] ss:$48 sps:$4 sm:$0xff]   ;;  %v1215_v35 = vld [vmem:[#allocation4 + $0x2c] ss:$48 sps:$4 sm:$0xff]  }
  0x74   : > { %v1210_v36 = vld [vmem:[#allocation4 + $0x20] ss:$48 sps:$4 sm:$0xff]   ;;  %v1213_v37 = vld [vmem:[#allocation4 + $0x28] ss:$48 sps:$4 sm:$0xff]   ;;  %v1218_v38 = vld [vmem:[#allocation4 + $0x84] ss:$48 sps:$4 sm:$0xff]  }
  0x75   : > { %v1221_v39 = vld [vmem:[#allocation4 + $0x8c] ss:$48 sps:$4 sm:$0xff]   ;;  %v1216_v40 = vld [vmem:[#allocation4 + $0x80] ss:$48 sps:$4 sm:$0xff]   ;;  %v1219_v41 = vld [vmem:[#allocation4 + $0x88] ss:$48 sps:$4 sm:$0xff]  }
  0x76   : > { %554 = vmatpush1.bf16.msra.mxu0 %v1183_v15  ;;  %597 = vmatpush1.bf16.msra.mxu1 %v1184_v16  ;;  %v1224_v42 = vld [vmem:[#allocation4 + $0xe4] ss:$48 sps:$4 sm:$0xff]   ;;  %v1227_v43 = vld [vmem:[#allocation4 + $0xec] ss:$48 sps:$4 sm:$0xff]   ;;  %v1222_v44 = vld [vmem:[#allocation4 + $0xe0] ss:$48 sps:$4 sm:$0xff]  }
  0x77   : > { %633 = vmatprep.subr.bf16.mxu0 %v1188_v17  ;;  %676 = vmatprep.subr.bf16.mxu1 %v1191_v18  ;;  %v1225_v45 = vld [vmem:[#allocation4 + $0xe8] ss:$48 sps:$4 sm:$0xff]   ;;  %v1230_v46 = vld [vmem:[#allocation4 + $0x144] ss:$48 sps:$4 sm:$0xff]   ;;  %v1233_v47 = vld [vmem:[#allocation4 + $0x14c] ss:$48 sps:$4 sm:$0xff]  }
  0x78   : > { %v1228_v48 = vld [vmem:[#allocation4 + $0x140] ss:$48 sps:$4 sm:$0xff]   ;;  %v1231_v49 = vld [vmem:[#allocation4 + $0x148] ss:$48 sps:$4 sm:$0xff]   ;;  %s1683_s16 = smov (!%p215_p6, %s1411_s16), 1  ;;  %v1591_v59 = vshrl.u32 %v271_v50, 7 }
  0x79   : > { %1066 = vmatmul.mubr.msk.bf16.vlgmr.msra.gmra.mrb[0].mxu0 %vm543_vm0, %v1556_v19  ;;  %1067 = vmatmul.mubr.msk.bf16.vlgmr.msra.gmra.mrb[0].mxu1 %vm543_vm0, %v1556_v19  ;;  %s1091_s17 = smul.u32 192, %s1683_s16  ;;  %v276_v55 = vld [vmem:[#allocation6 + $0x10] sm:$0xff]  ;;  %v277_v56 = vld [vmem:[#allocation6 + $0x18] sm:$0xff]  ;;  %v274_v2 = vld [vmem:[#allocation6] sm:$0xff] }
  0x7a   : > { %634 = vmatpush1.bf16.msra.mxu0 %v1186_v20  ;;  %677 = vmatpush1.bf16.msra.mxu1 %v1189_v21  ;;  %v288_v60 = vld [vmem:[#allocation6 + $0x70] sm:$0xff]  ;;  %v286_v7 = vld [vmem:[#allocation6 + $0x60] sm:$0xff]  ;;  %v275_v11 = vld [vmem:[#allocation6 + $0x8] sm:$0xff]  ;;  %vm809_vm2 = vcmp.lt.s32.totalorder %v1591_v59, 1  ;;  %vm814_vm3 = vcmp.ge.s32.totalorder %v1591_v59, 1  ;;  %v1596_v16 = vsub.s32 %v833_v1, %v1591_v59 }
  0x7b   : > { %635 = vmatprep.subr.bf16.mxu0 %v1194_v22  ;;  %678 = vmatprep.subr.bf16.mxu1 %v1197_v23  ;;  %s1579_s11 = scalar_lea.vmem %s1664_s3, %s1091_s17  ;;  %v287_v12 = vld [vmem:[#allocation6 + $0x68] sm:$0xff] }
  0x7c   : > { %665 = vmatprep.mubr.bf16.mxu0 %v1369_v0  ;;  %708 = vmatprep.mubr.bf16.mxu1 %v1369_v0  ;;  %1082 = vst.msk [vmem:[%s1579_s11 + $0x80] ss:$8 sm:$0x3] %vm1581_vm1, %v1370_v52  ;;  %1087 = vst.msk [vmem:[%s1579_s11 + $0xb0] ss:$8 sm:$0x3] %vm1581_vm1, %v1370_v52 }
  0x7d   : > { %v290_v52 = vld [vmem:[#allocation6 + $0x80] sm:$0xff] }
  0x7e   : > { %636 = vmatpush1.bf16.msra.mxu0 %v1192_v24  ;;  %679 = vmatpush1.bf16.msra.mxu1 %v1195_v25 }
  0x7f   : > { %637 = vmatprep.subr.bf16.mxu0 %v1200_v26  ;;  %680 = vmatprep.subr.bf16.mxu1 %v1203_v27 }
  0x82   : > { %638 = vmatpush1.bf16.msra.mxu0 %v1198_v28  ;;  %681 = vmatpush1.bf16.msra.mxu1 %v1201_v29 }
  0x83   : > { %639 = vmatprep.subr.bf16.mxu0 %v1206_v30  ;;  %682 = vmatprep.subr.bf16.mxu1 %v1209_v31 }
  0x86   : > { %640 = vmatpush1.bf16.msra.mxu0 %v1204_v32  ;;  %683 = vmatpush1.bf16.msra.mxu1 %v1207_v33 }
  0x87   : > { %719 = vmatprep.subr.bf16.mxu0 %v1212_v34  ;;  %762 = vmatprep.subr.bf16.mxu1 %v1215_v35 }
  0x89   : > { %1068 = vmatmul.mubr.msk.bf16.vlgmr.msra.gmra.mrb[4].mxu0 %vm543_vm0, %v1556_v19  ;;  %1069 = vmatmul.mubr.msk.bf16.vlgmr.msra.gmra.mrb[4].mxu1 %vm543_vm0, %v1556_v19 }
  0x8a   : > { %720 = vmatpush1.bf16.msra.mxu0 %v1210_v36  ;;  %763 = vmatpush1.bf16.msra.mxu1 %v1213_v37  ;;  %v280_v36 = vld [vmem:[#allocation6 + $0x30] sm:$0xff] }
  0x8b   : > { %721 = vmatprep.subr.bf16.mxu0 %v1218_v38  ;;  %764 = vmatprep.subr.bf16.mxu1 %v1221_v39  ;;  %v281_v38 = vld [vmem:[#allocation6 + $0x38] sm:$0xff] }
  0x8c   : > { %751 = vmatprep.mubr.bf16.mxu0 %v1369_v0  ;;  %794 = vmatprep.mubr.bf16.mxu1 %v1369_v0  ;;  %v289_v0 = vld [vmem:[#allocation6 + $0x78] sm:$0xff] }
  0x8e   : > { %722 = vmatpush1.bf16.msra.mxu0 %v1216_v40  ;;  %765 = vmatpush1.bf16.msra.mxu1 %v1219_v41  ;;  %v292_v41 = vld [vmem:[#allocation6 + $0x90] sm:$0xff] }
  0x8f   : > { %723 = vmatprep.subr.bf16.mxu0 %v1224_v42  ;;  %766 = vmatprep.subr.bf16.mxu1 %v1227_v43 }
  0x92   : > { %724 = vmatpush1.bf16.msra.mxu0 %v1222_v44  ;;  %767 = vmatpush1.bf16.msra.mxu1 %v1225_v45  ;;  %v293_v45 = vld [vmem:[#allocation6 + $0x98] sm:$0xff] }
  0x93   : > { %725 = vmatprep.subr.bf16.mxu0 %v1230_v46  ;;  %768 = vmatprep.subr.bf16.mxu1 %v1233_v47  ;;  %v278_v46 = vld [vmem:[#allocation6 + $0x20] sm:$0xff] }
  0x96   : > { %726 = vmatpush1.bf16.msra.mxu0 %v1228_v48  ;;  %769 = vmatpush1.bf16.msra.mxu1 %v1231_v49 }
  0x99   : > { %1070 = vmatmul.mubr.msk.bf16.vlgmr.msra.gmra.mrb[8].mxu0 %vm543_vm0, %v1556_v19  ;;  %1071 = vmatmul.mubr.msk.bf16.vlgmr.msra.gmra.mrb[8].mxu1 %vm543_vm0, %v1556_v19 }
 0x14c   : > { %v581_v57 = vpop.f32.mrb[0].mxu0  ;;  %v624_v58 = vpop.f32.mrb[0].mxu1 }
 0x14d   : > { %v625_v61 = vadd.f32 %v624_v58, %v276_v55  ;;  %v583_v62 = vpop.f32.mrb[1].mxu0  ;;  %v626_v63 = vpop.f32.mrb[1].mxu1  ;;  %v582_v14 = vadd.f32 %v581_v57, %v274_v2  ;;  %v291_v57 = vld [vmem:[#allocation6 + $0x88] sm:$0xff] }
 0x14e   : > { %v627_v3 = vadd.f32 %v626_v63, %v277_v56  ;;  %v585_v4 = vpop.f32.mrb[2].mxu0  ;;  %v628_v5 = vpop.f32.mrb[2].mxu1  ;;  %v584_v21 = vadd.f32 %v583_v62, %v275_v11  ;;  %v279_v56 = vld [vmem:[#allocation6 + $0x28] sm:$0xff] }
 0x14f   : > { %v805_v6 = vrot.slane %v625_v61, 7  ;;  %v629_v8 = vadd.f32 %v628_v5, %v288_v60  ;;  %v587_v9 = vpop.f32.mrb[3].mxu0  ;;  %v630_v10 = vpop.f32.mrb[3].mxu1  ;;  %v586_v18 = vadd.f32 %v585_v4, %v286_v7 }
 0x150   : > { %v631_v13 = vadd.f32 %v630_v10, %v289_v0  ;;  %v806_v17 = vrot.slane %v627_v3, 7  ;;  %v588_v24 = vadd.f32 %v587_v9, %v287_v12 }
 0x151   : > { %v807_v15 = vrot.slane %v629_v8, 7 }
 0x152   : > { %v808_v19 = vrot.slane %v631_v13, 7  ;;  %v830_v20 = vcombine.high %v629_v8, %v631_v13 }
 0x153   : > { %v810_v22 = vsel %vm809_vm2, %v805_v6, %v807_v15  ;;  %v812_v23 = vsel %vm809_vm2, %v807_v15, %v805_v6 }
 0x154   : > { %v816_v25 = vsel %vm814_vm3, %v812_v23, 0.0  ;;  %v822_v26 = vadd.f32 %v810_v22, %v586_v18  ;;  %v811_v27 = vsel %vm809_vm2, %v806_v17, %v808_v19  ;;  %v813_v28 = vsel %vm809_vm2, %v808_v19, %v806_v17  ;;  %v282_v18 = vld [vmem:[#allocation6 + $0x40] sm:$0xff]  ;;  %v284_v19 = vld [vmem:[#allocation6 + $0x50] sm:$0xff]  ;;  %v285_v22 = vld [vmem:[#allocation6 + $0x58] sm:$0xff] }
 0x155   : > { %v820_v29 = vadd.f32 %v816_v25, %v582_v14  ;;  %v817_v30 = vsel %vm814_vm3, %v813_v28, 0.0  ;;  %v823_v31 = vadd.f32 %v811_v27, %v588_v24  ;;  %v837_v32 = vrot.slane %v830_v20, %v1596_v16  ;;  %v294_v24 = vld [vmem:[#allocation6 + $0xa0] sm:$0xff]  ;;  %v296_v25 = vld [vmem:[#allocation6 + $0xb0] sm:$0xff] }
 0x156   : > { %826 = vst [vmem:[%s1579_s11 + $0x10] sm:$0xff] %v822_v26  ;;  %v821_v33 = vadd.f32 %v817_v30, %v584_v21  ;;  %v283_v21 = vld [vmem:[#allocation6 + $0x48] sm:$0xff]  ;;  %v297_v30 = vld [vmem:[#allocation6 + $0xb8] sm:$0xff] }
 0x157   : > { %824 = vst [vmem:[%s1579_s11] sm:$0xff] %v820_v29  ;;  %827 = vst [vmem:[%s1579_s11 + $0x18] sm:$0xff] %v823_v31  ;;  %v838_v34 = vcombine.high %v837_v32, %v837_v32  ;;  %v295_v29 = vld [vmem:[#allocation6 + $0xa8] sm:$0xff] }
 0x158   : > { %825 = vst [vmem:[%s1579_s11 + $0x8] sm:$0xff] %v821_v33 }
 0x159   : > { %v845_v35 = vrot.slane %v838_v34, %v1596_v16 }
 0x15b   : > { %v846_v37 = vcombine.high %v845_v35, %v845_v35 }
 0x15c   : > { %v667_v39 = vpop.f32.mrb[4].mxu0  ;;  %v710_v40 = vpop.f32.mrb[4].mxu1 }
 0x15d   : > { %1072 = vst.msk [vmem:[%s1579_s11 + $0x20] ss:$8 sm:$0x3] %vm1581_vm1, %v846_v37  ;;  %v711_v42 = vadd.f32 %v710_v40, %v280_v36  ;;  %v669_v43 = vpop.f32.mrb[5].mxu0  ;;  %v712_v44 = vpop.f32.mrb[5].mxu1  ;;  %v668_v60 = vadd.f32 %v667_v39, %v278_v46 }
 0x15e   : > { %v713_v47 = vadd.f32 %v712_v44, %v281_v38  ;;  %v671_v48 = vpop.f32.mrb[6].mxu0  ;;  %v714_v49 = vpop.f32.mrb[6].mxu1  ;;  %v670_v2 = vadd.f32 %v669_v43, %v279_v56 }
 0x15f   : > { %v855_v50 = vrot.slane %v711_v42, 7  ;;  %v715_v53 = vadd.f32 %v714_v49, %v292_v41  ;;  %v673_v54 = vpop.f32.mrb[7].mxu0  ;;  %v716_v55 = vpop.f32.mrb[7].mxu1  ;;  %v672_v63 = vadd.f32 %v671_v48, %v290_v52 }
 0x160   : > { %v717_v58 = vadd.f32 %v716_v55, %v293_v45  ;;  %v856_v62 = vrot.slane %v713_v47, 7  ;;  %v674_v5 = vadd.f32 %v673_v54, %v291_v57 }
 0x161   : > { %v857_v61 = vrot.slane %v715_v53, 7 }
 0x162   : > { %v858_v0 = vrot.slane %v717_v58, 7  ;;  %v878_v1 = vcombine.high %v715_v53, %v717_v58 }
 0x163   : > { %v859_v3 = vsel %vm809_vm2, %v855_v50, %v857_v61  ;;  %v861_v4 = vsel %vm809_vm2, %v857_v61, %v855_v50 }
 0x164   : > { %v863_v6 = vsel %vm814_vm3, %v861_v4, 0.0  ;;  %v869_v7 = vadd.f32 %v859_v3, %v672_v63  ;;  %v860_v8 = vsel %vm809_vm2, %v856_v62, %v858_v0  ;;  %v862_v9 = vsel %vm809_vm2, %v858_v0, %v856_v62 }
 0x165   : > { %v867_v10 = vadd.f32 %v863_v6, %v668_v60  ;;  %v864_v11 = vsel %vm814_vm3, %v862_v9, 0.0  ;;  %v870_v12 = vadd.f32 %v860_v8, %v674_v5  ;;  %v885_v13 = vrot.slane %v878_v1, %v1596_v16 }
 0x166   : > { %1075 = vst [vmem:[%s1579_s11 + $0x40] sm:$0xff] %v869_v7  ;;  %v868_v14 = vadd.f32 %v864_v11, %v670_v2 }
 0x167   : > { %1073 = vst [vmem:[%s1579_s11 + $0x30] sm:$0xff] %v867_v10  ;;  %1076 = vst [vmem:[%s1579_s11 + $0x48] sm:$0xff] %v870_v12  ;;  %v886_v15 = vcombine.high %v885_v13, %v885_v13 }
 0x168   : > { %1074 = vst [vmem:[%s1579_s11 + $0x38] sm:$0xff] %v868_v14 }
 0x169   : > { %v893_v17 = vrot.slane %v886_v15, %v1596_v16 }
 0x16b   : > { %v894_v20 = vcombine.high %v893_v17, %v893_v17 }
 0x16c   : > { %v753_v59 = vpop.f32.mrb[8].mxu0  ;;  %v796_v23 = vpop.f32.mrb[8].mxu1 }
 0x16d   : > { %1077 = vst.msk [vmem:[%s1579_s11 + $0x50] ss:$8 sm:$0x3] %vm1581_vm1, %v894_v20  ;;  %v754_v26 = vadd.f32 %v753_v59, %v282_v18  ;;  %v797_v27 = vadd.f32 %v796_v23, %v284_v19  ;;  %v755_v28 = vpop.f32.mrb[9].mxu0  ;;  %v798_v16 = vpop.f32.mrb[9].mxu1 }
 0x16e   : > { %v756_v31 = vadd.f32 %v755_v28, %v283_v21  ;;  %v799_v32 = vadd.f32 %v798_v16, %v285_v22  ;;  %v757_v33 = vpop.f32.mrb[10].mxu0  ;;  %v800_v34 = vpop.f32.mrb[10].mxu1 }
 0x16f   : > { %1078 = vst [vmem:[%s1579_s11 + $0x60] sm:$0xff] %v754_v26  ;;  %1083 = vst [vmem:[%s1579_s11 + $0x90] sm:$0xff] %v797_v27  ;;  %v758_v51 = vadd.f32 %v757_v33, %v294_v24  ;;  %v801_v35 = vadd.f32 %v800_v34, %v296_v25  ;;  %v759_v36 = vpop.f32.mrb[11].mxu0  ;;  %v802_v37 = vpop.f32.mrb[11].mxu1 }
 0x170   : > { %1079 = vst [vmem:[%s1579_s11 + $0x68] sm:$0xff] %v756_v31  ;;  %1084 = vst [vmem:[%s1579_s11 + $0x98] sm:$0xff] %v799_v32  ;;  %v760_v38 = vadd.f32 %v759_v36, %v295_v29  ;;  %v803_v39 = vadd.f32 %v802_v37, %v297_v30 }
 0x171   : > { %1080 = vst [vmem:[%s1579_s11 + $0x70] sm:$0xff] %v758_v51  ;;  %1085 = vst [vmem:[%s1579_s11 + $0xa0] sm:$0xff] %v801_v35 }
 0x172   : > { %1081 = vst [vmem:[%s1579_s11 + $0x78] sm:$0xff] %v760_v38  ;;  %1086 = vst [vmem:[%s1579_s11 + $0xa8] sm:$0xff] %v803_v39 }
 0x173 PF: > { %p14_p9 = scmp.ge.s32.totalorder %s1485_s29, 4   ;;  %s1678_s12 = smov %s1350_s13 }
 0x174   : > { %s1679_s13 = smov %s1354_s14  ;;  %s1680_s14 = smov %s1494_s5 }
 0x175   : > { %s1681_s15 = smov %s1485_s29  ;;  %16 = sbr.rel (!%p14_p9) target bundleno = 4 (0x4), region = 87 }
 0x17c   :  { %936 = vsyncpa [#allocation3], 1 }
 0x17d   :  { %938 = vsyncpa [#allocation3 + $0x1], 1 }
 0x17e   :  { %939 = vsyncpa [#allocation5], 1 }

</bundles_post_ra>
